<compile_context>
chip_gen: v7x
topology: tpu7x:2x2x1
jax: 0.10.0
libtpu: 0.0.40
codegen_flags: <defaults>
</compile_context>

<pallas_src>
import functools
import math

import jax
import jax.numpy as jnp
from jax.experimental import pallas as pl
from jax.experimental.pallas import tpu as pltpu

_LANE = 128                  # TPU lane width
_MAX_BLOCK_ELEMS = 1 << 20   # 1M elems -> 4 MiB f32 per input per pipeline buffer
_MIN_SEQ_STEPS = 4           # aim for >= 4 grid steps so double-buffering overlaps


def _ce_kernel(p_ref, t_ref, o_ref, acc_ref, *, rows, row_tile, needs_mask):
    """Accumulate targets * log(inputs) elementwise; reduce + store once at the end."""
    i = pl.program_id(0)

    @pl.when(i == 0)
    def _():
        acc_ref[...] = jnp.zeros_like(acc_ref)

    p = p_ref[...].astype(jnp.float32)
    t = t_ref[...].astype(jnp.float32)
    contrib = t * jnp.log(p)                      # VPU mul + EUP log only; no XLU
    if needs_mask:
        # Only the final (edge) block contains Pallas row padding with
        # unspecified values; mask the product so garbage never reaches acc.
        row_iota = jax.lax.broadcasted_iota(jnp.int32, contrib.shape, 0)
        contrib = jnp.where(row_iota < rows - i * row_tile, contrib, 0.0)
    acc_ref[...] += contrib

    @pl.when(i == pl.num_programs(0) - 1)
    def _():
        # Single cross-lane/sublane reduce + scalar store, done once per call.
        o_ref[...] = (-jnp.sum(acc_ref[...])).reshape(1, 1)


def custom_ce(inputs: jax.Array, targets: jax.Array) -> jax.Array:
    """Pallas implementation of CustomCE.forward: -sum(targets * log(inputs))."""
    assert inputs.shape == targets.shape
    total = math.prod(inputs.shape)

    # ---- zero-copy layout: view both tensors as a lane-dense (rows, lanes) slab.
    # Row-major reshapes are free; no dtype pre-cast (upcast happens in-kernel).
    p_flat = inputs.reshape(-1)
    t_flat = targets.reshape(-1)
    pad = (-total) % _LANE
    if pad:
        # Only for totals not divisible by 128: pad < 128 elements with
        # (p=1, t=0) so padding contributes exactly 0 (log 1 == 0).
        # TODO(synk): for huge ragged tensors this still copies the slab once;
        #             a tiny second call over the <128-element tail would avoid it.
        p_flat = jnp.concatenate([p_flat, jnp.ones((pad,), p_flat.dtype)])
        t_flat = jnp.concatenate([t_flat, jnp.zeros((pad,), t_flat.dtype)])
    padded_total = total + pad

    lanes = max(w for w in (1024, 512, 256, 128) if padded_total % w == 0)
    rows = padded_total // lanes
    p2d = p_flat.reshape(rows, lanes)
    t2d = t_flat.reshape(rows, lanes)

    # ---- row tiling: big blocks, >= _MIN_SEQ_STEPS sequential steps when
    # possible, row tile a multiple of the sublane quantum (8).
    max_row_tile = max(8, _MAX_BLOCK_ELEMS // lanes)
    if rows <= 8:
        row_tile = rows                            # single full block
    else:
        tgt = pl.cdiv(rows, _MIN_SEQ_STEPS)
        tgt = max(8, pl.cdiv(tgt, 8) * 8)
        row_tile = min(max_row_tile, tgt)
    grid_rows = pl.cdiv(rows, row_tile)
    needs_mask = (rows % row_tile) != 0            # static: only edge block needs it

    block = (row_tile, lanes)
    kernel = functools.partial(
        _ce_kernel, rows=rows, row_tile=row_tile, needs_mask=needs_mask)

    bytes_accessed = (p2d.size * p2d.dtype.itemsize
                      + t2d.size * t2d.dtype.itemsize + 4)

    out = pl.pallas_call(
        kernel,
        out_shape=jax.ShapeDtypeStruct((1, 1), jnp.float32),
        grid_spec=pltpu.PrefetchScalarGridSpec(
            num_scalar_prefetch=0,
            grid=(grid_rows,),
            in_specs=[pl.BlockSpec(block, lambda i: (i, 0)),
                      pl.BlockSpec(block, lambda i: (i, 0))],
            out_specs=pl.BlockSpec((1, 1), lambda i: (0, 0)),
            scratch_shapes=[pltpu.VMEM(block, jnp.float32)],
        ),
        compiler_params=pltpu.CompilerParams(
            dimension_semantics=("arbitrary",),
            vmem_limit_bytes=32 << 20,
        ),
        cost_estimate=pl.CostEstimate(
            flops=2 * total,
            transcendentals=total,
            bytes_accessed=bytes_accessed,
        ),
    )(p2d, t2d)

    # loss.mean() on a 0-dim tensor is the identity -> this is the final loss.
    return out[0, 0]


if __name__ == "__main__":
    key = jax.random.PRNGKey(0)
    k1, k2, k3, k4 = jax.random.split(key, 4)

    # Case 1: the module's natural use -- softmax probabilities vs one-hot labels
    # ("4-dimensional vectors"); total=64 exercises the small/ragged path.
    N, C = 16, 4
    probs = jax.nn.softmax(jax.random.normal(k1, (N, C), dtype=jnp.float32), axis=-1)
    labels = jax.random.randint(k2, (N,), 0, C)
    onehot = jax.nn.one_hot(labels, C, dtype=jnp.float32)

    loss = custom_ce(probs, onehot)
    jax.block_until_ready(loss)
    ref = -jnp.sum(onehot * jnp.log(probs))
    assert jnp.allclose(loss, ref, rtol=1e-5, atol=1e-5), (loss, ref)

    # Case 2: zero-copy path with a multi-step grid and an edge block that
    # exercises the in-kernel mask (rows % row_tile != 0).
    M, K = 33, 128
    p2 = jax.nn.softmax(jax.random.normal(k3, (M, K), dtype=jnp.float32), axis=-1)
    t2 = jax.nn.one_hot(jax.random.randint(k4, (M,), 0, K), K, dtype=jnp.float32)
    loss2 = custom_ce(p2, t2)
    jax.block_until_ready(loss2)
    ref2 = -jnp.sum(t2 * jnp.log(p2))
    assert jnp.allclose(loss2, ref2, rtol=1e-5, atol=1e-5), (loss2, ref2)

    print("KERNEL_OK")
</pallas_src>

<mosaic_0001>
module attributes {stable_mosaic.version = 11 : i64} {
  func.func @_ce_kernel(%arg0: i32, %arg1: memref<1x128xf32, #tpu.memory_space<vmem>>, %arg2: memref<1x128xf32, #tpu.memory_space<vmem>>, %arg3: memref<1x1xf32, #tpu.memory_space<vmem>>, %arg4: memref<1x128xf32, #tpu.memory_space<vmem>>) attributes {dimension_semantics = [#tpu.dimension_semantics<arbitrary>], iteration_bounds = array<i64: 1>, scalar_prefetch = 0 : i64, scratch_operands = 1 : i64, tpu.core_type = #tpu.core_type<tc>, window_params = [{transform_indices = @transform_0, window_bounds = array<i64: 1, 128>}, {transform_indices = @transform_1, window_bounds = array<i64: 1, 128>}, {pipeline_mode = #tpu.pipeline_mode<synchronous>, transform_indices = @transform_2, window_bounds = array<i64: 1, 1>}]} {
    %c0_i32 = arith.constant 0 : i32
    %0 = arith.cmpi eq, %arg0, %c0_i32 : i32
    %1 = arith.extui %0 : i1 to i32
    %c0_i32_0 = arith.constant 0 : i32
    %2 = arith.cmpi ne, %1, %c0_i32_0 : i32
    scf.if %2 {
      %cst = arith.constant 0.000000e+00 : f32
      %13 = vector.broadcast %cst : f32 to vector<1x128xf32>
      %c0_10 = arith.constant 0 : index
      %c0_11 = arith.constant 0 : index
      %14 = vector.load %arg4[%c0_10, %c0_11] : memref<1x128xf32, #tpu.memory_space<vmem>>, vector<1x128xf32>
      tpu.vector_store %arg4[%c0_10, %c0_11], %13 {strides = array<i32>} : memref<1x128xf32, #tpu.memory_space<vmem>>, vector<1x128xf32>,
    } else {
    }
    %c0 = arith.constant 0 : index
    %c0_1 = arith.constant 0 : index
    %3 = vector.load %arg1[%c0, %c0_1] : memref<1x128xf32, #tpu.memory_space<vmem>>, vector<1x128xf32>
    %c0_2 = arith.constant 0 : index
    %c0_3 = arith.constant 0 : index
    %4 = vector.load %arg2[%c0_2, %c0_3] : memref<1x128xf32, #tpu.memory_space<vmem>>, vector<1x128xf32>
    %5 = math.log %3 : vector<1x128xf32>
    %6 = arith.mulf %4, %5 : vector<1x128xf32>
    %c0_4 = arith.constant 0 : index
    %c0_5 = arith.constant 0 : index
    %7 = vector.load %arg4[%c0_4, %c0_5] : memref<1x128xf32, #tpu.memory_space<vmem>>, vector<1x128xf32>
    %8 = arith.addf %7, %6 : vector<1x128xf32>
    %c0_6 = arith.constant 0 : index
    %c0_7 = arith.constant 0 : index
    %9 = vector.load %arg4[%c0_6, %c0_7] : memref<1x128xf32, #tpu.memory_space<vmem>>, vector<1x128xf32>
    tpu.vector_store %arg4[%c0_6, %c0_7], %8 {strides = array<i32>} : memref<1x128xf32, #tpu.memory_space<vmem>>, vector<1x128xf32>,
    %c0_i32_8 = arith.constant 0 : i32
    %10 = arith.cmpi eq, %arg0, %c0_i32_8 : i32
    %11 = arith.extui %10 : i1 to i32
    %c0_i32_9 = arith.constant 0 : i32
    %12 = arith.cmpi ne, %11, %c0_i32_9 : i32
    scf.if %12 {
      %c0_10 = arith.constant 0 : index
      %c0_11 = arith.constant 0 : index
      %13 = vector.load %arg4[%c0_10, %c0_11] : memref<1x128xf32, #tpu.memory_space<vmem>>, vector<1x128xf32>
      %14 = vector.shape_cast %13 : vector<1x128xf32> to vector<1x1x128xf32>
      %cst = arith.constant dense<0.000000e+00> : vector<1xf32>
      %15 = vector.multi_reduction <add>, %14, %cst [1, 2] : vector<1x1x128xf32> to vector<1xf32>
      %16 = vector.shape_cast %15 : vector<1xf32> to vector<1x1x1xf32>
      %17 = vector.extract %16[0, 0, 0] : f32 from vector<1x1x1xf32>
      %cst_12 = arith.constant 0.000000e+00 : f32
      %18 = arith.subf %cst_12, %17 : f32
      %19 = vector.broadcast %18 : f32 to vector<1x1xf32>
      %c0_13 = arith.constant 0 : index
      %c0_14 = arith.constant 0 : index
      %20 = vector.load %arg3[%c0_13, %c0_14] : memref<1x1xf32, #tpu.memory_space<vmem>>, vector<1x1xf32>
      tpu.vector_store %arg3[%c0_13, %c0_14], %19 {strides = array<i32>} : memref<1x1xf32, #tpu.memory_space<vmem>>, vector<1x1xf32>,
    } else {
    }
    return
  }
  func.func @transform_0(%arg0: i32) -> (i32, i32) {
    %c0_i32 = arith.constant 0 : i32
    %c0_i32_0 = arith.constant 0 : i32
    return %arg0, %c0_i32 : i32, i32
  }
  func.func @transform_1(%arg0: i32) -> (i32, i32) {
    %c0_i32 = arith.constant 0 : i32
    %c0_i32_0 = arith.constant 0 : i32
    return %arg0, %c0_i32 : i32, i32
  }
  func.func @transform_2(%arg0: i32) -> (i32, i32) {
    %c0_i32 = arith.constant 0 : i32
    %c0_i32_0 = arith.constant 0 : i32
    %c0_i32_1 = arith.constant 0 : i32
    return %c0_i32, %c0_i32_0 : i32, i32
  }
}

</mosaic_0001>

<bundles_post_ra>
// kernel: tpu_custom_call.1
= control target key start
LH: loop header
LB: loop body
LE: loop exit
PB: predicated region body
PF: predicated region fallthrough
CT: control target
= control target key end

     0   :  { %7 = vsyncpa [#allocation4], 0  ;;  %s171_s0 = inlined_call_operand.hbm [shape: f32[1,128], index: 0, kind: input, shape index: {}]   ;;  %s172_s1 = inlined_call_operand.vmem [shape: f32[1,128], index: 1, kind: input, shape index: {}]   ;;  %s173_s2 = inlined_call_operand.hbm [shape: f32[1,1], index: 2, kind: output, shape index: {}]  }
   0x1   :  { %8 = vsyncpa [#allocation5], 0  ;;  %s126_s9 = smov [#allocation3]   ;;  %s78_s13 = scalar_lea.hbm %s171_s0, 16 }
   0x2   :  { %s15_s10 = sshll.u32 %s126_s9, 4  ;;  %p79_p0 = scmp.ne.s32.totalorder %s171_s0, %s78_s13  ;;  %s16_s10 = int_to_ptr.vmem [resolvable:$true] %s15_s10 }
   0x3   :  { %p82_p1 = scmp.lt.u32.totalorder %s78_s13, %s171_s0 }
   0x5   :  { %p84_p2 = pnand %p82_p1, %p79_p0 }
   0x7   :  { %87 = shalt.err (!%p84_p2)
}
   0x8   :  { %s88_s18 = scalar_lea.vmem %s16_s10, 16  ;;  %s92_s19 = scalar_lea.vmem %s16_s10, 32 }
   0x9   :  { %p89_p3 = scmp.ne.s32.totalorder %s16_s10, %s88_s18  ;;  %p93_p4 = scmp.lt.s32.totalorder %s16_s10, %s16_s10 }
   0xa   :  { %p94_p5 = scmp.lt.s32.totalorder %s92_s19, %s88_s18 }
   0xc   :  { %p95_p6 = por %p94_p5, %p93_p4 }
   0xe   :  { %p96_p7 = pnand %p95_p6, %p89_p3 }
  0x10   :  { %99 = shalt.err (!%p96_p7)
}
  0x11   :  { %18 = dma.hbm_to_vmem [thread:$0]  %s171_s0, 16, %s16_s10, [#allocation4]  }
  0x12   :  { %122 = dma.done.wait [#allocation4], 16  }
  0x13   :  { %123 = vsyncadd [#allocation4], 4294967280  ;;  %v127_v0 = vmov 0.0   ;;  %v29_v1 = vld [vmem:[#allocation3] sm:$0x1]  ;;  %vm41_vm0 = vcmask 1040384  }
  0x14   :  { %28 = vst [vmem:[#allocation2] sm:$0x1] %v127_v0  ;;  %76 = vlog2.f32 %v29_v1  ;;  %v30_v3 = vld [vmem:[%s172_s1] sm:$0x1]  ;;  %s128_s0 = smov [#allocation6]   ;;  %vm54_vm1 = vcmask 0  }
  0x15   :  { %s62_s24 = sshll.u32 %s128_s0, 4  ;;  %s63_s24 = int_to_ptr.vmem [resolvable:$true] %s62_s24 }
  0x16   :  { %s100_s26 = scalar_lea.vmem %s63_s24, 16  ;;  %s104_s27 = scalar_lea.vmem %s63_s24, 32 }
  0x17   :  { %p101_p8 = scmp.ne.s32.totalorder %s63_s24, %s100_s26  ;;  %p105_p9 = scmp.lt.s32.totalorder %s63_s24, %s63_s24 }
  0x18   :  { %p106_p10 = scmp.lt.s32.totalorder %s104_s27, %s100_s26 }
  0x1a   :  { %p107_p11 = por %p106_p10, %p105_p9 }
  0x1b   :  { %v34_v5 = vld [vmem:[#allocation2] sm:$0x1] }
  0x1c   :  { %p108_p12 = pnand %p107_p11, %p101_p8 }
  0x1e   :  { %v77_v2 = vpop.eup %76 }
  0x1f   :  { %v32_v4 = vmul.f32 0.6931472, %v77_v2 }
  0x21   :  { %v33_v6 = vmul.f32 %v32_v4, %v30_v3 }
  0x23   :  { %v35_v7 = vadd.f32 %v34_v5, %v33_v6 }
  0x25   :  { %36 = vst [vmem:[#allocation2] sm:$0x1] %v35_v7 }
  0x2c   :  { %v40_v8 = vld [vmem:[#allocation2] sm:$0x1] }
  0x2d   :  { %v42_v9 = vsel %vm41_vm0, %v40_v8, 0.0 }
  0x2e   :  { %43 = vadd.xlane.f32.xlu0 %v42_v9 }
  0xbb   :  { %v44_v10 = vpop.xlane.xlu0 %43 }
  0xbc   :  { %v45_v11 = vrot.slane %v44_v10, 4 }
  0xbe   :  { %v46_v12 = vadd.f32 %v45_v11, %v44_v10 }
  0xc0   :  { %v47_v13 = vrot.slane %v46_v12, 2 }
  0xc2   :  { %v48_v14 = vadd.f32 %v47_v13, %v46_v12 }
  0xc4   :  { %v49_v15 = vrot.slane %v48_v14, 1 }
  0xc6   :  { %v50_v16 = vadd.f32 %v49_v15, %v48_v14 }
  0xc8   :  { %71 = vpush %v50_v16 }
  0xf9   :  { %s72_s1 = spop %71 }
  0xfa   :  { %s52_s25 = ssub.f32 0.0, %s72_s1 }
  0xfc   :  { %v53_v17 = vstv %s52_s25 }
  0xfd   :  { %55 = vst.msk [vmem:[#allocation6] sm:$0x1] %vm54_vm1, %v53_v17 }
  0xfe   :  { %111 = shalt.err (!%p108_p12)
}
  0xff   :  { %s112_s30 = scalar_lea.hbm %s173_s2, 16 }
 0x100   :  { %p113_p13 = scmp.ne.s32.totalorder %s173_s2, %s112_s30  ;;  %p116_p0 = scmp.lt.u32.totalorder %s112_s30, %s173_s2 }
 0x102   :  { %p118_p1 = pnand %p116_p0, %p113_p13 }
 0x104   :  { %121 = shalt.err (!%p118_p1)
}
 0x105   :  { %65 = dma.vmem_to_hbm [thread:$0]  %s63_s24, 16, %s173_s2, [#allocation5]  }
 0x106   :  { %124 = dma.done.wait [#allocation5], 16  }
 0x107   :  { %125 = vsyncadd [#allocation5], 4294967280 }
 0x108   :  { %69 = vsyncpa [#allocation4], 1 }
 0x109   :  { %70 = vsyncpa [#allocation5], 1 }

</bundles_post_ra>
